<compile_context>
chip_gen: v6e
topology: v6e:2x2x1
jax: 0.10.0
libtpu: 0.0.40
codegen_flags: <defaults>
</compile_context>

<pallas_src>
import functools

import jax
import jax.numpy as jnp
from jax.experimental import pallas as pl
from jax.experimental.pallas import tpu as pltpu


def _normalize_kernel(x_ref, gain_ref, bias_ref, o_ref, *, epsilon, nfeat):
    x = x_ref[...].astype(jnp.float32)            # (TR, F)
    gain = gain_ref[...].astype(jnp.float32)      # (1, F)
    bias = bias_ref[...].astype(jnp.float32)      # (1, F)

    # Fused single-pass reduction over the lane axis (XLU).
    s1 = jnp.sum(x, axis=-1, keepdims=True)       # (TR, 1)
    s2 = jnp.sum(x * x, axis=-1, keepdims=True)   # (TR, 1)

    inv_n = jnp.float32(1.0 / nfeat)
    mu = s1 * inv_n                                # (TR, 1)
    # Unbiased variance (torch.var default): (sum(x^2) - N*mu^2) / (N - 1).
    # Clamp at 0 to guard against catastrophic cancellation (e.g. constant rows).
    var = (s2 - jnp.float32(nfeat) * mu * mu) * jnp.float32(1.0 / (nfeat - 1))
    var = jnp.maximum(var, 0.0)
    sigma = jnp.sqrt(var + epsilon)                # (TR, 1), EUP sqrt on a column

    # Per-row inverse on the (TR,1) column (EUP / cheap), then pure multiplies on
    # the full tile instead of a (TR, F) divide.
    inv = pl.reciprocal(sigma + epsilon, approx=False)   # (TR, 1)

    out = gain * ((x - mu) * inv) + bias
    o_ref[...] = out.astype(o_ref.dtype)


def normalize(x, gain, bias, epsilon=1e-6, block_rows=512):
    """Pallas equivalent of Normalize.forward(x, dim=-1)."""
    orig_shape = x.shape
    nfeat = orig_shape[-1]
    # Note: nfeat == 1 would divide by zero in the unbiased variance (torch.var
    # returns NaN in that case too); not guarded here.
    x2 = x.reshape(-1, nfeat)
    rows = x2.shape[0]

    # Row tile: full extent for small inputs, otherwise 512 (multiple of 8/16,
    # keeps the double-buffered per-block footprint well under the v7x 64 MiB
    # VMEM ceiling for realistic feature counts; v5e/v6e have plenty of room).
    tr = rows if rows <= block_rows else block_rows
    grid = (pl.cdiv(rows, tr),)

    kernel = functools.partial(_normalize_kernel, epsilon=epsilon, nfeat=nfeat)

    out = pl.pallas_call(
        kernel,
        out_shape=jax.ShapeDtypeStruct((rows, nfeat), x.dtype),
        grid=grid,
        in_specs=[
            pl.BlockSpec((tr, nfeat), lambda i: (i, 0)),    # x: row-tiled
            pl.BlockSpec((1, nfeat), lambda i: (0, 0)),     # gain: resident
            pl.BlockSpec((1, nfeat), lambda i: (0, 0)),     # bias: resident
        ],
        out_specs=pl.BlockSpec((tr, nfeat), lambda i: (i, 0)),
        compiler_params=pltpu.CompilerParams(
            dimension_semantics=("parallel",),              # rows independent -> v7x 2 TCs
        ),
    )(x2, gain.reshape(1, nfeat), bias.reshape(1, nfeat))

    return out.reshape(orig_shape)


def _reference(x, gain, bias, epsilon=1e-6):
    x32 = x.astype(jnp.float32)
    mu = jnp.mean(x32, axis=-1, keepdims=True)
    var = jnp.var(x32, axis=-1, keepdims=True, ddof=1)      # unbiased like torch
    sigma = jnp.sqrt(var + epsilon)
    return (gain * (x32 - mu) / (sigma + epsilon) + bias).astype(x.dtype)


if __name__ == "__main__":
    key = jax.random.PRNGKey(0)

    # Primary (small) case matching the module's typical usage: (batch, seq, features).
    batch, seq, features = 2, 8, 32
    k1, k2 = jax.random.split(key)
    x = jax.random.normal(k1, (batch, seq, features), dtype=jnp.float32)
    gain = jnp.ones((features,), dtype=jnp.float32)
    bias = jnp.zeros((features,), dtype=jnp.float32)

    out = normalize(x, gain, bias)
    jax.block_until_ready(out)
    ref = _reference(x, gain, bias)
    assert out.shape == x.shape and out.dtype == x.dtype
    assert jnp.allclose(out, ref, atol=1e-5, rtol=1e-5)

    # Secondary case exercising the multi-block / partial-tail row tiling path
    # (rows = 4*160 = 640 > 512) with non-trivial gain/bias.
    b2, s2_, f2 = 4, 160, 64
    x2 = jax.random.normal(k2, (b2, s2_, f2), dtype=jnp.float32) * 2.0 + 0.5
    gain2 = jnp.linspace(0.5, 1.5, f2, dtype=jnp.float32)
    bias2 = jnp.linspace(-0.25, 0.25, f2, dtype=jnp.float32)

    out2 = normalize(x2, gain2, bias2)
    jax.block_until_ready(out2)
    ref2 = _reference(x2, gain2, bias2)
    assert out2.shape == x2.shape and out2.dtype == x2.dtype
    assert jnp.allclose(out2, ref2, atol=1e-5, rtol=1e-5)

    print("KERNEL_OK")
</pallas_src>

<mosaic_0001>
module attributes {stable_mosaic.version = 11 : i64} {
  func.func @_normalize_kernel(%arg0: i32, %arg1: memref<16x32xf32, #tpu.memory_space<vmem>>, %arg2: memref<1x32xf32, #tpu.memory_space<vmem>>, %arg3: memref<1x32xf32, #tpu.memory_space<vmem>>, %arg4: memref<16x32xf32, #tpu.memory_space<vmem>>) attributes {dimension_semantics = [#tpu.dimension_semantics<parallel>], iteration_bounds = array<i64: 1>, scalar_prefetch = 0 : i64, scratch_operands = 0 : i64, tpu.core_type = #tpu.core_type<tc>, window_params = [{transform_indices = @transform_0, window_bounds = array<i64: 16, 32>}, {pipeline_mode = #tpu.pipeline_mode<synchronous>, transform_indices = @transform_1, window_bounds = array<i64: 1, 32>}, {pipeline_mode = #tpu.pipeline_mode<synchronous>, transform_indices = @transform_2, window_bounds = array<i64: 1, 32>}, {transform_indices = @transform_3, window_bounds = array<i64: 16, 32>}]} {
    %c0 = arith.constant 0 : index
    %c0_0 = arith.constant 0 : index
    %0 = vector.load %arg1[%c0, %c0_0] : memref<16x32xf32, #tpu.memory_space<vmem>>, vector<16x32xf32>
    %c0_1 = arith.constant 0 : index
    %c0_2 = arith.constant 0 : index
    %1 = vector.load %arg2[%c0_1, %c0_2] : memref<1x32xf32, #tpu.memory_space<vmem>>, vector<1x32xf32>
    %c0_3 = arith.constant 0 : index
    %c0_4 = arith.constant 0 : index
    %2 = vector.load %arg3[%c0_3, %c0_4] : memref<1x32xf32, #tpu.memory_space<vmem>>, vector<1x32xf32>
    %cst = arith.constant dense<0.000000e+00> : vector<16xf32>
    %3 = vector.multi_reduction <add>, %0, %cst [1] : vector<16x32xf32> to vector<16xf32>
    %4 = vector.shape_cast %3 : vector<16xf32> to vector<16x1xf32>
    %5 = arith.mulf %0, %0 : vector<16x32xf32>
    %cst_5 = arith.constant dense<0.000000e+00> : vector<16xf32>
    %6 = vector.multi_reduction <add>, %5, %cst_5 [1] : vector<16x32xf32> to vector<16xf32>
    %7 = vector.shape_cast %6 : vector<16xf32> to vector<16x1xf32>
    %cst_6 = arith.constant 3.125000e-02 : f32
    %8 = vector.broadcast %cst_6 : f32 to vector<16x1xf32>
    %9 = arith.mulf %4, %8 : vector<16x1xf32>
    %cst_7 = arith.constant 3.200000e+01 : f32
    %10 = vector.broadcast %cst_7 : f32 to vector<16x1xf32>
    %11 = arith.mulf %10, %9 : vector<16x1xf32>
    %12 = arith.mulf %11, %9 : vector<16x1xf32>
    %13 = arith.subf %7, %12 : vector<16x1xf32>
    %cst_8 = arith.constant 0.0322580636 : f32
    %14 = vector.broadcast %cst_8 : f32 to vector<16x1xf32>
    %15 = arith.mulf %13, %14 : vector<16x1xf32>
    %cst_9 = arith.constant 0.000000e+00 : f32
    %16 = vector.broadcast %cst_9 : f32 to vector<16x1xf32>
    %17 = arith.maximumf %15, %16 : vector<16x1xf32>
    %cst_10 = arith.constant 9.99999997E-7 : f32
    %18 = vector.broadcast %cst_10 : f32 to vector<16x1xf32>
    %19 = arith.addf %17, %18 : vector<16x1xf32>
    %20 = math.sqrt %19 : vector<16x1xf32>
    %cst_11 = arith.constant 9.99999997E-7 : f32
    %21 = vector.broadcast %cst_11 : f32 to vector<16x1xf32>
    %22 = arith.addf %20, %21 : vector<16x1xf32>
    %23 = tpu.reciprocal %22 : vector<16x1xf32> -> vector<16x1xf32>
    %24 = vector.broadcast %9 : vector<16x1xf32> to vector<16x32xf32>
    %25 = arith.subf %0, %24 : vector<16x32xf32>
    %26 = vector.broadcast %23 : vector<16x1xf32> to vector<16x32xf32>
    %27 = arith.mulf %25, %26 : vector<16x32xf32>
    %28 = vector.broadcast %1 : vector<1x32xf32> to vector<16x32xf32>
    %29 = arith.mulf %28, %27 : vector<16x32xf32>
    %30 = vector.broadcast %2 : vector<1x32xf32> to vector<16x32xf32>
    %31 = arith.addf %29, %30 : vector<16x32xf32>
    %c0_12 = arith.constant 0 : index
    %c0_13 = arith.constant 0 : index
    %32 = vector.load %arg4[%c0_12, %c0_13] : memref<16x32xf32, #tpu.memory_space<vmem>>, vector<16x32xf32>
    tpu.vector_store %arg4[%c0_12, %c0_13], %31 {strides = array<i32>} : memref<16x32xf32, #tpu.memory_space<vmem>>, vector<16x32xf32>,
    return
  }
  func.func @transform_0(%arg0: i32) -> (i32, i32) {
    %c0_i32 = arith.constant 0 : i32
    %c0_i32_0 = arith.constant 0 : i32
    return %arg0, %c0_i32 : i32, i32
  }
  func.func @transform_1(%arg0: i32) -> (i32, i32) {
    %c0_i32 = arith.constant 0 : i32
    %c0_i32_0 = arith.constant 0 : i32
    %c0_i32_1 = arith.constant 0 : i32
    return %c0_i32, %c0_i32_0 : i32, i32
  }
  func.func @transform_2(%arg0: i32) -> (i32, i32) {
    %c0_i32 = arith.constant 0 : i32
    %c0_i32_0 = arith.constant 0 : i32
    %c0_i32_1 = arith.constant 0 : i32
    return %c0_i32, %c0_i32_0 : i32, i32
  }
  func.func @transform_3(%arg0: i32) -> (i32, i32) {
    %c0_i32 = arith.constant 0 : i32
    %c0_i32_0 = arith.constant 0 : i32
    return %arg0, %c0_i32 : i32, i32
  }
}

</mosaic_0001>

<bundles_post_ra>
// kernel: tpu_custom_call.1
= control target key start
LH: loop header
LB: loop body
LE: loop exit
PB: predicated region body
PF: predicated region fallthrough
CT: control target
= control target key end

     0   :  { %8 = vsyncpa [#allocation3], 0  ;;  %s225_s0 = inlined_call_operand.hbm [shape: f32[16,32], index: 0, kind: input, shape index: {}]   ;;  %s226_s1 = inlined_call_operand.vmem [shape: f32[1,32], index: 1, kind: input, shape index: {}]   ;;  %s227_s2 = inlined_call_operand.vmem [shape: f32[1,32], index: 2, kind: input, shape index: {}]   ;;  %s228_s3 = inlined_call_operand.hbm [shape: f32[16,32], index: 3, kind: output, shape index: {}]  }
   0x1   :  { %9 = vsyncpa [#allocation4], 0  ;;  %s177_s12 = smov [#allocation2]  }
   0x2   :  { %s15_s13 = sshll.u32 %s177_s12, 4  ;;  %s16_s13 = int_to_ptr.vmem [resolvable:$true] %s15_s13 }
   0x3   :  { %s141_s14 = scalar_lea.vmem %s16_s13, 256  ;;  %p146_p1 = scmp.lt.s32.totalorder %s16_s13, %s16_s13 }
   0x4   :  { %p142_p0 = scmp.ne.s32.totalorder %s16_s13, %s141_s14  ;;  %p147_p2 = scmp.lt.s32.totalorder %s141_s14, %s141_s14 }
   0x6   :  { %p148_p3 = por %p147_p2, %p146_p1 }
   0x8   :  { %p149_p4 = pnand %p148_p3, %p142_p0 }
   0xa   :  { %152 = shalt.err (!%p149_p4)
}
   0xb   :  { %s178_s15 = smov 128   ;;  %s179_s16 = smov 8  }
   0xc   :  { %21 = dma.hbm_to_vmem [thread:$0]  %s225_s0, 256, %s16_s13, [#allocation3], %s178_s15, %s178_s15, %s179_s16  }
   0xd   :  { %173 = dma.done.wait [#allocation3], 256  }
   0xe   :  { %174 = vsyncadd [#allocation3], 4294967040  ;;  %vm33_vm0 = vcmask 261120   ;;  %v29_v0 = vld [vmem:[#allocation2] sm:$0xff]  ;;  %v30_v1 = vld [vmem:[#allocation2 + $0x8] sm:$0xff]  ;;  %s180_s22 = smov [#allocation5]  }
   0xf   :  { %v34_v2 = vsel %vm33_vm0, %v29_v0, 0.0  ;;  %v40_v3 = vmul.f32 %v29_v0, %v29_v0  ;;  %v41_v4 = vmul.f32 %v30_v1, %v30_v1  ;;  %v37_v5 = vsel %vm33_vm0, %v30_v1, 0.0  ;;  %v119_v40 = vld [vmem:[%s226_s1] ss:$0 sm:$0xff]  ;;  %s107_s23 = sshll.u32 %s180_s22, 4  ;;  %s108_s23 = int_to_ptr.vmem [resolvable:$true] %s107_s23 }
  0x10   :  { %35 = vadd.xlane.f32.xlu0 %v34_v2  ;;  %v120_v42 = vld [vmem:[%s227_s2] ss:$0 sm:$0xff]  ;;  %s153_s1 = scalar_lea.vmem %s108_s23, 256  ;;  %p158_p6 = scmp.lt.s32.totalorder %s108_s23, %s108_s23 }
  0x11   :  { %v42_v6 = vsel %vm33_vm0, %v40_v3, 0.0  ;;  %v45_v7 = vsel %vm33_vm0, %v41_v4, 0.0  ;;  %p154_p5 = scmp.ne.s32.totalorder %s108_s23, %s153_s1  ;;  %p159_p7 = scmp.lt.s32.totalorder %s153_s1, %s153_s1 }
  0x12   :  { %43 = vadd.xlane.f32.xlu1 %v42_v6 }
  0x13   :  { %p160_p8 = por %p159_p7, %p158_p6 }
  0x14   :  { %38 = vadd.xlane.f32.xlu0 %v37_v5 }
  0x15   :  { %p161_p9 = pnand %p160_p8, %p154_p5 }
  0x16   :  { %46 = vadd.xlane.f32.xlu1 %v45_v7 }
  0x99   :  { %v36_v8 = vpop.xlane.xlu0 %35 }
  0x9a   :  { %v48_v9 = vmul.f32 0.03125, %v36_v8 }
  0x9b   :  { %v44_v10 = vpop.xlane.xlu1 %43 }
  0x9c   :  { %v50_v11 = vmul.f32 32.0, %v48_v9  ;;  %v80_v38 = vsub.f32 %v29_v0, %v48_v9 }
  0x9d   :  { %v39_v12 = vpop.xlane.xlu0 %38 }
  0x9e   :  { %v49_v13 = vmul.f32 0.03125, %v39_v12  ;;  %v52_v14 = vmul.f32 %v50_v11, %v48_v9 }
  0x9f   :  { %v47_v17 = vpop.xlane.xlu1 %46 }
  0xa0   :  { %v51_v15 = vmul.f32 32.0, %v49_v13  ;;  %v54_v16 = vsub.f32 %v44_v10, %v52_v14  ;;  %v81_v44 = vsub.f32 %v30_v1, %v49_v13 }
  0xa2   :  { %v56_v18 = vmul.f32 0.032258064, %v54_v16  ;;  %v53_v19 = vmul.f32 %v51_v15, %v49_v13 }
  0xa4   :  { %v58_v20 = vmax.f32 %v56_v18, 0.0  ;;  %v55_v21 = vsub.f32 %v47_v17, %v53_v19 }
  0xa6   :  { %v60_v22 = vadd.f32 1e-06, %v58_v20  ;;  %v57_v23 = vmul.f32 0.032258064, %v55_v21 }
  0xa8   :  { %125 = vrsqrt.f32 %v60_v22  ;;  %v59_v24 = vmax.f32 %v57_v23, 0.0  ;;  %vm64_vm1 = vcmp.eq.f32.partialorder %v60_v22, inf  ;;  %v67_v28 = vand.u32 2147483648, %v60_v22 }
  0xa9   :  { %vm66_vm2 = vcmp.eq.f32.partialorder %v60_v22, 0.0 }
  0xaa   :  { %v61_v25 = vadd.f32 1e-06, %v59_v24 }
  0xac   :  { %127 = vrsqrt.f32 %v61_v25  ;;  %vm71_vm3 = vcmp.eq.f32.partialorder %v61_v25, inf  ;;  %v74_v34 = vand.u32 2147483648, %v61_v25  ;;  %vm73_vm4 = vcmp.eq.f32.partialorder %v61_v25, 0.0 }
  0xb5   :  { %v126_v26 = vpop.eup %125 }
  0xb6   :  { %v63_v27 = vmul.f32 %v126_v26, %v60_v22 }
  0xb8   :  { %v65_v29 = vsel %vm64_vm1, %v60_v22, %v63_v27 }
  0xb9   :  { %v68_v30 = vsel %vm66_vm2, %v67_v28, %v65_v29  ;;  %v128_v31 = vpop.eup %127 }
  0xba   :  { %v76_v32 = vadd.f32 1e-06, %v68_v30  ;;  %v70_v33 = vmul.f32 %v128_v31, %v61_v25 }
  0xbc   :  { %129 = vrcp.f32 %v76_v32  ;;  %v72_v35 = vsel %vm71_vm3, %v61_v25, %v70_v33 }
  0xbd   :  { %v75_v36 = vsel %vm73_vm4, %v74_v34, %v72_v35 }
  0xbe   :  { %v77_v37 = vadd.f32 1e-06, %v75_v36 }
  0xc0   :  { %131 = vrcp.f32 %v77_v37 }
  0xc9   :  { %v130_v39 = vpop.eup %129 }
  0xca   :  { %v82_v41 = vmul.f32 %v130_v39, %v80_v38 }
  0xcc   :  { %v90_v43 = vmul.f32 %v119_v40, %v82_v41 }
  0xcd   :  { %v132_v45 = vpop.eup %131 }
  0xce   :  { %v98_v46 = vadd.f32 %v120_v42, %v90_v43  ;;  %v83_v47 = vmul.f32 %v132_v45, %v81_v44 }
  0xd0   :  { %100 = vst.msk [vmem:[#allocation5] sm:$0xff] %vm33_vm0, %v98_v46  ;;  %v91_v48 = vmul.f32 %v119_v40, %v83_v47 }
  0xd2   :  { %v99_v49 = vadd.f32 %v120_v42, %v91_v48 }
  0xd4   :  { %101 = vst.msk [vmem:[#allocation5 + $0x8] sm:$0xff] %vm33_vm0, %v99_v49 }
  0xd5   :  { %164 = shalt.err (!%p161_p9)
}
  0xd6   :  { %113 = dma.vmem_to_hbm [thread:$0]  %s108_s23, 256, %s228_s3, [#allocation4], %s178_s15, %s178_s15, %s179_s16  }
  0xd7   :  { %175 = dma.done.wait [#allocation4], 256  }
  0xd8   :  { %176 = vsyncadd [#allocation4], 4294967040 }
  0xd9   :  { %117 = vsyncpa [#allocation3], 1 }
  0xda   :  { %118 = vsyncpa [#allocation4], 1 }

</bundles_post_ra>
